<compile_context>
chip_gen: v7x
topology: tpu7x:2x2x1
jax: 0.10.0
libtpu: 0.0.40
codegen_flags: <defaults>
</compile_context>

<pallas_src>
import functools

import jax
import jax.numpy as jnp
from jax.experimental import pallas as pl
from jax.experimental.pallas import tpu as pltpu


def _round_up(x, m):
    return ((x + m - 1) // m) * m


def _focal_math(x, z, pw, alpha, gamma, label_smoothing):
    """Elementwise focal BCE-with-logits in f32.

    x: logits (tile), z: targets (tile), pw: (rows,1) pos_weight column or None.
    """
    if label_smoothing > 0.0:
        z = z * (1.0 - label_smoothing) + 0.5 * label_smoothing

    # Single exp reused for softplus(-x) and sigmoid(x).
    e = jnp.exp(-jnp.abs(x))
    softplus_neg_x = jnp.maximum(-x, 0.0) + jnp.log1p(e)

    if pw is None:
        bce = (1.0 - z) * x + softplus_neg_x
    else:
        bce = (1.0 - z) * x + (1.0 + (pw - 1.0) * z) * softplus_neg_x

    # sigmoid(x) from e:  x>=0 -> 1/(1+e),  x<0 -> e/(1+e)
    inv_one_plus_e = pl.reciprocal(1.0 + e)
    p = jnp.where(x >= 0.0, inv_one_plus_e, e * inv_one_plus_e)
    p_t = jnp.where(z >= 0.5, p, 1.0 - p)
    u = 1.0 - p_t

    g = float(gamma)
    if g == int(g) and 0 <= int(g) <= 8:
        gi = int(g)
        if gi == 0:
            fw = jnp.ones_like(u)
        else:
            fw = u
            for _ in range(gi - 1):
                fw = fw * u
    else:
        # TODO(synk): non-integer gamma keeps jnp.power (exp∘log) fallback.
        fw = jnp.power(u, jnp.float32(g))

    if alpha is not None:
        a = float(alpha)
        fw = jnp.where(z >= 0.5, jnp.float32(a), jnp.float32(1.0 - a)) * fw

    return fw * bce


def _focal_map_kernel(*refs, alpha, gamma, label_smoothing, has_pw):
    if has_pw:
        pred_ref, target_ref, pw_ref, out_ref = refs
        pw = pw_ref[...].astype(jnp.float32)
    else:
        pred_ref, target_ref, out_ref = refs
        pw = None
    x = pred_ref[...].astype(jnp.float32)
    z = target_ref[...].astype(jnp.float32)
    loss = _focal_math(x, z, pw, alpha, gamma, label_smoothing)
    out_ref[...] = loss.astype(out_ref.dtype)


def _focal_reduce_kernel(*refs, alpha, gamma, label_smoothing, has_pw,
                         rows, cols, row_tile, col_tile, inv_count, need_mask):
    if has_pw:
        pred_ref, target_ref, pw_ref, out_ref = refs
        pw = pw_ref[...].astype(jnp.float32)
    else:
        pred_ref, target_ref, out_ref = refs
        pw = None

    i = pl.program_id(0)
    j = pl.program_id(1)
    ni = pl.num_programs(0)
    nj = pl.num_programs(1)

    @pl.when(jnp.logical_and(i == 0, j == 0))
    def _init():
        out_ref[...] = jnp.zeros_like(out_ref)

    x = pred_ref[...].astype(jnp.float32)
    z = target_ref[...].astype(jnp.float32)
    loss = _focal_math(x, z, pw, alpha, gamma, label_smoothing)

    if need_mask:
        row_ids = i * row_tile + jax.lax.broadcasted_iota(
            jnp.int32, (row_tile, col_tile), 0)
        col_ids = j * col_tile + jax.lax.broadcasted_iota(
            jnp.int32, (row_tile, col_tile), 1)
        valid = jnp.logical_and(row_ids < rows, col_ids < cols)
        loss = jnp.where(valid, loss, 0.0)

    # f32 accumulation in the resident (1,1) output block.
    out_ref[...] += jnp.sum(loss, keepdims=True)

    @pl.when(jnp.logical_and(i == ni - 1, j == nj - 1))
    def _finalize():
        out_ref[...] = out_ref[...] * jnp.float32(inv_count)


def focal_loss(pred, target, *, alpha=0.25, gamma=2.0, reduction="none",
               pos_weight=None, label_smoothing=0.0,
               row_tile=None, col_tile=None):
    """Pallas forward pass equivalent to FocalLoss.forward."""
    B, C, H, W, D = pred.shape
    rows, cols = B * C, H * W * D

    # Keep target narrow in HBM; cast to f32 in-kernel. (bool -> int8 for DMA.)
    if target.dtype == jnp.bool_:
        target = target.astype(jnp.int8)

    pred2 = pred.reshape(rows, cols)
    targ2 = target.reshape(rows, cols)

    # --- tile selection: lane-dense, ~2 MiB f32 blocks, minimal padding ------
    rows8 = _round_up(rows, 8)
    cols128 = _round_up(cols, 128)
    if row_tile is None:
        nr = -(-rows8 // 256)
        row_tile = _round_up(-(-rows8 // nr), 8)
    if col_tile is None:
        nc = -(-cols128 // 2048)
        col_tile = _round_up(-(-cols128 // nc), 128)
    row_tile = _round_up(min(int(row_tile), rows8), 8)
    col_tile = _round_up(min(int(col_tile), cols128), 128)

    rows_p = _round_up(rows, row_tile)
    cols_p = _round_up(cols, col_tile)
    padded = (rows_p != rows) or (cols_p != cols)

    if padded:
        pred2 = jnp.pad(pred2, ((0, rows_p - rows), (0, cols_p - cols)))
        targ2 = jnp.pad(targ2, ((0, rows_p - rows), (0, cols_p - cols)))

    has_pw = pos_weight is not None
    inputs = [pred2, targ2]
    in_specs = [
        pl.BlockSpec((row_tile, col_tile), lambda i, j: (i, j)),
        pl.BlockSpec((row_tile, col_tile), lambda i, j: (i, j)),
    ]
    if has_pw:
        pw = jnp.asarray(pos_weight, jnp.float32).reshape(C)
        pw_rows = jnp.broadcast_to(pw[None, :], (B, C)).reshape(rows, 1)
        if rows_p != rows:
            pw_rows = jnp.pad(pw_rows, ((0, rows_p - rows), (0, 0)),
                              constant_values=1.0)
        inputs.append(pw_rows)
        in_specs.append(pl.BlockSpec((row_tile, 1), lambda i, j: (i, 0)))

    grid = (rows_p // row_tile, cols_p // col_tile)

    # VMEM budget: (pred + target + out) blocks, double-buffered, 2x headroom.
    out_itemsize = jnp.dtype(pred.dtype).itemsize
    blk_bytes = row_tile * col_tile * (jnp.dtype(pred2.dtype).itemsize
                                       + jnp.dtype(targ2.dtype).itemsize
                                       + out_itemsize)
    if has_pw:
        blk_bytes += row_tile * 4
    vmem_limit = int(min(max(4 * blk_bytes, 16 * 1024 * 1024),
                         56 * 1024 * 1024))

    alpha_f = None if alpha is None else float(alpha)
    gamma_f = float(gamma)
    ls_f = float(label_smoothing)

    if reduction in ("mean", "sum"):
        n_elems = rows * cols
        inv_count = (1.0 / float(n_elems)) if reduction == "mean" else 1.0
        kernel = functools.partial(
            _focal_reduce_kernel, alpha=alpha_f, gamma=gamma_f,
            label_smoothing=ls_f, has_pw=has_pw, rows=rows, cols=cols,
            row_tile=row_tile, col_tile=col_tile, inv_count=inv_count,
            need_mask=padded)
        out = pl.pallas_call(
            kernel,
            out_shape=jax.ShapeDtypeStruct((1, 1), jnp.float32),
            grid_spec=pltpu.PrefetchScalarGridSpec(
                num_scalar_prefetch=0, grid=grid,
                in_specs=in_specs,
                out_specs=pl.BlockSpec((1, 1), lambda i, j: (0, 0))),
            compiler_params=pltpu.CompilerParams(
                dimension_semantics=("arbitrary", "arbitrary"),
                vmem_limit_bytes=vmem_limit),
        )(*inputs)
        return out[0, 0].astype(pred.dtype)

    # reduction == 'none'
    kernel = functools.partial(
        _focal_map_kernel, alpha=alpha_f, gamma=gamma_f,
        label_smoothing=ls_f, has_pw=has_pw)
    out2 = pl.pallas_call(
        kernel,
        out_shape=jax.ShapeDtypeStruct((rows_p, cols_p), pred.dtype),
        grid_spec=pltpu.PrefetchScalarGridSpec(
            num_scalar_prefetch=0, grid=grid,
            in_specs=in_specs,
            out_specs=pl.BlockSpec((row_tile, col_tile), lambda i, j: (i, j))),
        compiler_params=pltpu.CompilerParams(
            dimension_semantics=("parallel", "parallel"),
            vmem_limit_bytes=vmem_limit),
    )(*inputs)
    if padded:
        out2 = out2[:rows, :cols]
    return out2.reshape(B, C, H, W, D)


def _focal_loss_ref(pred, target, *, alpha=0.25, gamma=2.0, reduction="none",
                    pos_weight=None, label_smoothing=0.0):
    """Pure-JAX reference mirroring the PyTorch module."""
    x = pred.astype(jnp.float32)
    z = target.astype(jnp.float32)
    if label_smoothing > 0.0:
        z = z * (1.0 - label_smoothing) + 0.5 * label_smoothing
    if pos_weight is None:
        pw = jnp.float32(1.0)
    else:
        pw = jnp.asarray(pos_weight, jnp.float32).reshape(1, -1, 1, 1, 1)
    sp = jnp.maximum(-x, 0.0) + jnp.log1p(jnp.exp(-jnp.abs(x)))
    bce = (1.0 - z) * x + (1.0 + (pw - 1.0) * z) * sp
    p = jax.nn.sigmoid(x)
    p_t = jnp.where(z >= 0.5, p, 1.0 - p)
    alpha_t = jnp.where(z >= 0.5, alpha, 1.0 - alpha) if alpha is not None else 1.0
    loss = alpha_t * (1.0 - p_t) ** gamma * bce
    if reduction == "mean":
        return loss.mean()
    if reduction == "sum":
        return loss.sum()
    return loss


if __name__ == "__main__":
    key = jax.random.PRNGKey(0)
    k1, k2, k3, k4 = jax.random.split(key, 4)

    # 1) default module config (alpha=0.25, gamma=2, no pos_weight,
    #    reduction='none'), aligned shape.
    B, C, H, W, D = 2, 4, 8, 8, 16
    pred = jax.random.normal(k1, (B, C, H, W, D), dtype=jnp.float32) * 3.0
    target = jax.random.bernoulli(k2, 0.3, (B, C, H, W, D)).astype(jnp.float32)
    out = jax.block_until_ready(focal_loss(pred, target))
    ref = _focal_loss_ref(pred, target)
    assert out.shape == (B, C, H, W, D)
    assert jnp.allclose(out, ref, atol=1e-5, rtol=1e-5), "mismatch: none/default"

    # 2) fused reduction='sum', no pos_weight.
    s = jax.block_until_ready(focal_loss(pred, target, reduction="sum"))
    s_ref = _focal_loss_ref(pred, target, reduction="sum")
    assert jnp.allclose(s, s_ref, rtol=1e-4, atol=1e-3), "mismatch: sum"

    # 3) ragged shape + pos_weight + label smoothing, reduction='none'
    #    (exercises padding + pw column path).
    B2, C2, H2, W2, D2 = 1, 3, 5, 7, 11
    pred2 = jax.random.normal(k3, (B2, C2, H2, W2, D2), dtype=jnp.float32) * 2.0
    target2 = jax.random.bernoulli(k4, 0.4, (B2, C2, H2, W2, D2)).astype(jnp.float32)
    pw = jnp.array([1.0, 2.0, 0.5], jnp.float32)
    out2 = jax.block_until_ready(
        focal_loss(pred2, target2, pos_weight=pw, label_smoothing=0.1))
    ref2 = _focal_loss_ref(pred2, target2, pos_weight=pw, label_smoothing=0.1)
    assert jnp.allclose(out2, ref2, atol=1e-5, rtol=1e-5), "mismatch: none/pw/pad"

    # 4) fused reduction='mean' on the ragged/pw/smoothed config (masked tail).
    m = jax.block_until_ready(
        focal_loss(pred2, target2, pos_weight=pw, label_smoothing=0.1,
                   reduction="mean"))
    m_ref = _focal_loss_ref(pred2, target2, pos_weight=pw, label_smoothing=0.1,
                            reduction="mean")
    assert jnp.allclose(m, m_ref, rtol=1e-4, atol=1e-6), "mismatch: mean/pw/pad"

    print("KERNEL_OK")
</pallas_src>

<mosaic_0001>
module attributes {stable_mosaic.version = 11 : i64} {
  func.func @_focal_map_kernel(%arg0: i32, %arg1: i32, %arg2: memref<8x1024xf32, #tpu.memory_space<vmem>>, %arg3: memref<8x1024xf32, #tpu.memory_space<vmem>>, %arg4: memref<8x1024xf32, #tpu.memory_space<vmem>>) attributes {dimension_semantics = [#tpu.dimension_semantics<parallel>, #tpu.dimension_semantics<parallel>], iteration_bounds = array<i64: 1, 1>, scalar_prefetch = 0 : i64, scratch_operands = 0 : i64, tpu.core_type = #tpu.core_type<tc>, window_params = [{transform_indices = @transform_0, window_bounds = array<i64: 8, 1024>}, {transform_indices = @transform_1, window_bounds = array<i64: 8, 1024>}, {transform_indices = @transform_2, window_bounds = array<i64: 8, 1024>}]} {
    %c0 = arith.constant 0 : index
    %c0_0 = arith.constant 0 : index
    %0 = vector.load %arg2[%c0, %c0_0] : memref<8x1024xf32, #tpu.memory_space<vmem>>, vector<8x1024xf32>
    %c0_1 = arith.constant 0 : index
    %c0_2 = arith.constant 0 : index
    %1 = vector.load %arg3[%c0_1, %c0_2] : memref<8x1024xf32, #tpu.memory_space<vmem>>, vector<8x1024xf32>
    %2 = math.absf %0 : vector<8x1024xf32>
    %cst = arith.constant 0.000000e+00 : f32
    %3 = vector.broadcast %cst : f32 to vector<8x1024xf32>
    %4 = arith.subf %3, %2 : vector<8x1024xf32>
    %5 = math.exp %4 : vector<8x1024xf32>
    %cst_3 = arith.constant 0.000000e+00 : f32
    %6 = vector.broadcast %cst_3 : f32 to vector<8x1024xf32>
    %7 = arith.subf %6, %0 : vector<8x1024xf32>
    %cst_4 = arith.constant 0.000000e+00 : f32
    %8 = vector.broadcast %cst_4 : f32 to vector<8x1024xf32>
    %9 = arith.maximumf %7, %8 : vector<8x1024xf32>
    %10 = math.log1p %5 : vector<8x1024xf32>
    %11 = arith.addf %9, %10 : vector<8x1024xf32>
    %cst_5 = arith.constant 1.000000e+00 : f32
    %12 = vector.broadcast %cst_5 : f32 to vector<8x1024xf32>
    %13 = arith.subf %12, %1 : vector<8x1024xf32>
    %14 = arith.mulf %13, %0 : vector<8x1024xf32>
    %15 = arith.addf %14, %11 : vector<8x1024xf32>
    %cst_6 = arith.constant 1.000000e+00 : f32
    %16 = vector.broadcast %cst_6 : f32 to vector<8x1024xf32>
    %17 = arith.addf %16, %5 : vector<8x1024xf32>
    %18 = tpu.reciprocal %17 : vector<8x1024xf32> -> vector<8x1024xf32>
    %cst_7 = arith.constant 0.000000e+00 : f32
    %19 = vector.broadcast %cst_7 : f32 to vector<8x1024xf32>
    %20 = arith.cmpf oge, %0, %19 : vector<8x1024xf32>
    %21 = arith.mulf %5, %18 : vector<8x1024xf32>
    %22 = arith.select %20, %18, %21 : vector<8x1024xi1>, vector<8x1024xf32>
    %cst_8 = arith.constant 5.000000e-01 : f32
    %23 = vector.broadcast %cst_8 : f32 to vector<8x1024xf32>
    %24 = arith.cmpf oge, %1, %23 : vector<8x1024xf32>
    %cst_9 = arith.constant 1.000000e+00 : f32
    %25 = vector.broadcast %cst_9 : f32 to vector<8x1024xf32>
    %26 = arith.subf %25, %22 : vector<8x1024xf32>
    %27 = arith.select %24, %22, %26 : vector<8x1024xi1>, vector<8x1024xf32>
    %cst_10 = arith.constant 1.000000e+00 : f32
    %28 = vector.broadcast %cst_10 : f32 to vector<8x1024xf32>
    %29 = arith.subf %28, %27 : vector<8x1024xf32>
    %30 = arith.mulf %29, %29 : vector<8x1024xf32>
    %cst_11 = arith.constant 5.000000e-01 : f32
    %31 = vector.broadcast %cst_11 : f32 to vector<8x1024xf32>
    %32 = arith.cmpf oge, %1, %31 : vector<8x1024xf32>
    %cst_12 = arith.constant 2.500000e-01 : f32
    %cst_13 = arith.constant 7.500000e-01 : f32
    %33 = vector.broadcast %cst_12 : f32 to vector<8x1024xf32>
    %34 = vector.broadcast %cst_13 : f32 to vector<8x1024xf32>
    %35 = arith.select %32, %33, %34 : vector<8x1024xi1>, vector<8x1024xf32>
    %36 = arith.mulf %35, %30 : vector<8x1024xf32>
    %37 = arith.mulf %36, %15 : vector<8x1024xf32>
    %c0_14 = arith.constant 0 : index
    %c0_15 = arith.constant 0 : index
    %38 = vector.load %arg4[%c0_14, %c0_15] : memref<8x1024xf32, #tpu.memory_space<vmem>>, vector<8x1024xf32>
    tpu.vector_store %arg4[%c0_14, %c0_15], %37 {strides = array<i32>} : memref<8x1024xf32, #tpu.memory_space<vmem>>, vector<8x1024xf32>,
    return
  }
  func.func @transform_0(%arg0: i32, %arg1: i32) -> (i32, i32) {
    %c0_i32 = arith.constant 0 : i32
    return %arg0, %arg1 : i32, i32
  }
  func.func @transform_1(%arg0: i32, %arg1: i32) -> (i32, i32) {
    %c0_i32 = arith.constant 0 : i32
    return %arg0, %arg1 : i32, i32
  }
  func.func @transform_2(%arg0: i32, %arg1: i32) -> (i32, i32) {
    %c0_i32 = arith.constant 0 : i32
    return %arg0, %arg1 : i32, i32
  }
}

</mosaic_0001>

<bundles_post_ra>
// kernel: tpu_custom_call.1
= control target key start
LH: loop header
LB: loop body
LE: loop exit
PB: predicated region body
PF: predicated region fallthrough
CT: control target
= control target key end

     0   :  { %7 = vsyncpa [#allocation3], 0  ;;  %s771_s0 = inlined_call_operand.hbm [shape: f32[8,1024], index: 0, kind: input, shape index: {}]   ;;  %s772_s1 = inlined_call_operand.hbm [shape: f32[8,1024], index: 1, kind: input, shape index: {}]   ;;  %s773_s2 = inlined_call_operand.hbm [shape: f32[8,1024], index: 2, kind: output, shape index: {}]  }
   0x1   :  { %8 = vsyncpa [#allocation6], 0 }
   0x2   :  { %9 = vsyncpa [#allocation4], 0  ;;  %s456_s9 = smov [#allocation2]   ;;  %s457_s11 = smov [#allocation5]  }
   0x3   :  { %s16_s10 = sshll.u32 %s456_s9, 4  ;;  %s26_s12 = sshll.u32 %s457_s11, 4  ;;  %s17_s10 = int_to_ptr.vmem [resolvable:$true] %s16_s10  ;;  %s27_s12 = int_to_ptr.vmem [resolvable:$true] %s26_s12 }
   0x4   :  { %s384_s15 = scalar_lea.hbm %s771_s0, 1024 }
   0x5   :  { %p385_p0 = scmp.ne.s32.totalorder %s771_s0, %s384_s15  ;;  %p388_p1 = scmp.lt.u32.totalorder %s384_s15, %s771_s0 }
   0x7   :  { %p390_p2 = pnand %p388_p1, %p385_p0 }
   0x9   :  { %393 = shalt.err (!%p390_p2)
}
   0xa   :  { %s394_s20 = scalar_lea.vmem %s17_s10, 1024  ;;  %p399_p4 = scmp.lt.s32.totalorder %s17_s10, %s17_s10 }
   0xb   :  { %p395_p3 = scmp.ne.s32.totalorder %s17_s10, %s394_s20  ;;  %p400_p5 = scmp.lt.s32.totalorder %s394_s20, %s394_s20 }
   0xd   :  { %p401_p6 = por %p400_p5, %p399_p4 }
   0xf   :  { %p402_p7 = pnand %p401_p6, %p395_p3 }
  0x11   :  { %405 = shalt.err (!%p402_p7)
}
  0x12   :  { %19 = dma.hbm_to_vmem [thread:$0]  %s771_s0, 1024, %s17_s10, [#allocation3]  }
  0x13   :  { %s406_s25 = scalar_lea.hbm %s772_s1, 1024 }
  0x14   :  { %p407_p8 = scmp.ne.s32.totalorder %s772_s1, %s406_s25  ;;  %p410_p9 = scmp.lt.u32.totalorder %s406_s25, %s772_s1 }
  0x16   :  { %p412_p10 = pnand %p410_p9, %p407_p8 }
  0x18   :  { %415 = shalt.err (!%p412_p10)
}
  0x19   :  { %s416_s30 = scalar_lea.vmem %s27_s12, 1024  ;;  %p421_p12 = scmp.lt.s32.totalorder %s27_s12, %s27_s12 }
  0x1a   :  { %p417_p11 = scmp.ne.s32.totalorder %s27_s12, %s416_s30  ;;  %p422_p13 = scmp.lt.s32.totalorder %s416_s30, %s416_s30 }
  0x1c   :  { %p423_p0 = por %p422_p13, %p421_p12 }
  0x1e   :  { %p424_p1 = pnand %p423_p0, %p417_p11 }
  0x20   :  { %427 = shalt.err (!%p424_p1)
}
  0x21   :  { %29 = dma.hbm_to_vmem [thread:$0]  %s772_s1, 1024, %s27_s12, [#allocation6]  }
  0x22   :  { %450 = dma.done.wait [#allocation3], 1024  }
  0x23   :  { %451 = vsyncadd [#allocation3], 4294966272 }
  0x24   :  { %452 = dma.done.wait [#allocation6], 1024  }
  0x25   :  { %453 = vsyncadd [#allocation6], 4294966272  ;;  %v499_v0 = vld [vmem:[#allocation2] sm:$0xff]  ;;  %v501_v1 = vld [vmem:[#allocation2 + $0x8] sm:$0xff]  ;;  %v774_v31 = vmov 0.75   ;;  %s459_s1 = smov [#allocation7]  }
  0x26   :  { %v52_v2 = vand.u32 2147483647, %v499_v0  ;;  %v53_v3 = vand.u32 2147483647, %v501_v1  ;;  %v505_v4 = vld [vmem:[#allocation2 + $0x10] sm:$0xff]  ;;  %v508_v9 = vld [vmem:[#allocation2 + $0x18] sm:$0xff] }
  0x27   :  { %v54_v8 = vand.u32 2147483647, %v505_v4  ;;  %v510_v10 = vld [vmem:[#allocation5] sm:$0xff]  ;;  %v84_v12 = vsub.f32 0.0, %v499_v0  ;;  %v55_v16 = vand.u32 2147483647, %v508_v9 }
  0x28   :  { %v60_v5 = vsub.f32 0.0, %v52_v2  ;;  %v61_v6 = vsub.f32 0.0, %v53_v3  ;;  %v180_v13 = vsub.f32 1.0, %v510_v10  ;;  %v514_v15 = vld [vmem:[#allocation2 + $0x20] sm:$0xff]  ;;  %v85_v17 = vsub.f32 0.0, %v501_v1  ;;  %v519_v19 = vld [vmem:[#allocation5 + $0x8] sm:$0xff] }
  0x29   :  { %v62_v14 = vsub.f32 0.0, %v54_v8  ;;  %vm244_vm0 = vcmp.ge.f32.partialorder %v510_v10, 0.5  ;;  %v63_v20 = vsub.f32 0.0, %v55_v16  ;;  %v56_v21 = vand.u32 2147483647, %v514_v15  ;;  %v522_v22 = vld [vmem:[#allocation2 + $0x28] sm:$0xff] }
  0x2a   :  { %v68_v7 = vmul.f32 1.442695, %v60_v5  ;;  %v70_v11 = vmul.f32 1.442695, %v61_v6  ;;  %v524_v23 = vmax.f32 %v84_v12, 0.0  ;;  %v527_v24 = vmul.f32 %v180_v13, %v499_v0  ;;  %v530_v26 = vld [vmem:[#allocation5 + $0x10] sm:$0xff] }
  0x2b   :  { %v72_v18 = vmul.f32 1.442695, %v62_v14  ;;  %v181_v25 = vsub.f32 1.0, %v519_v19  ;;  %v86_v27 = vsub.f32 0.0, %v505_v4  ;;  %v182_v28 = vsub.f32 1.0, %v530_v26  ;;  %v541_v34 = vld [vmem:[#allocation5 + $0x18] sm:$0xff] }
  0x2c   :  { %336 = vpow2.f32 %v68_v7  ;;  %v74_v29 = vmul.f32 1.442695, %v63_v20  ;;  %v64_v30 = vsub.f32 0.0, %v56_v21  ;;  %v537_v32 = vsel %vm244_vm0, 0.25, %v774_v31  ;;  %v556_v43 = vld [vmem:[#allocation2 + $0x30] sm:$0xff]  ;;  %v574_v49 = vld [vmem:[#allocation5 + $0x20] sm:$0xff] }
  0x2d   :  { %338 = vpow2.f32 %v70_v11  ;;  %v539_v33 = vmax.f32 %v85_v17, 0.0  ;;  %v87_v35 = vsub.f32 0.0, %v508_v9  ;;  %v57_v36 = vand.u32 2147483647, %v522_v22  ;;  %v606_v6 = vld [vmem:[#allocation5 + $0x28] sm:$0xff]  ;;  %s322_s4 = sshll.u32 %s459_s1, 4  ;;  %s323_s4 = int_to_ptr.vmem [resolvable:$true] %s322_s4 }
  0x2e   :  { %340 = vpow2.f32 %v72_v18  ;;  %vm245_vm1 = vcmp.ge.f32.partialorder %v519_v19, 0.5  ;;  %v183_v37 = vsub.f32 1.0, %v541_v34  ;;  %v76_v38 = vmul.f32 1.442695, %v64_v30  ;;  %s428_s5 = scalar_lea.vmem %s323_s4, 1024  ;;  %p433_p3 = scmp.lt.s32.totalorder %s323_s4, %s323_s4 }
  0x2f   :  { %342 = vpow2.f32 %v74_v29  ;;  %v548_v39 = vmul.f32 %v181_v25, %v501_v1  ;;  %v553_v40 = vsel %vm245_vm1, 0.25, %v774_v31  ;;  %v88_v41 = vsub.f32 0.0, %v514_v15  ;;  %p429_p2 = scmp.ne.s32.totalorder %s323_s4, %s428_s5  ;;  %p434_p4 = scmp.lt.s32.totalorder %s428_s5, %s428_s5 }
  0x30   :  { %v65_v42 = vsub.f32 0.0, %v57_v36  ;;  %v558_v44 = vmax.f32 %v86_v27, 0.0  ;;  %v561_v45 = vmul.f32 %v182_v28, %v505_v4  ;;  %vm246_vm2 = vcmp.ge.f32.partialorder %v530_v26, 0.5 }
  0x31   :  { %344 = vpow2.f32 %v76_v38  ;;  %v569_v47 = vsel %vm246_vm2, 0.25, %v774_v31  ;;  %v571_v48 = vmax.f32 %v87_v35, 0.0  ;;  %vm247_vm3 = vcmp.ge.f32.partialorder %v541_v34, 0.5  ;;  %p435_p5 = por %p434_p4, %p433_p3 }
  0x32   :  { %v78_v50 = vmul.f32 1.442695, %v65_v42  ;;  %v580_v53 = vmul.f32 %v183_v37, %v508_v9  ;;  %v585_v54 = vsel %vm247_vm3, 0.25, %v774_v31  ;;  %v58_v55 = vand.u32 2147483647, %v556_v43 }
  0x33   :  { %v589_v57 = vmax.f32 %v88_v41, 0.0  ;;  %v89_v58 = vsub.f32 0.0, %v522_v22  ;;  %vm248_vm4 = vcmp.ge.f32.partialorder %v574_v49, 0.5  ;;  %v184_v63 = vsub.f32 1.0, %v574_v49  ;;  %p436_p6 = pnand %p435_p5, %p429_p2 }
  0x34   :  { %346 = vpow2.f32 %v78_v50  ;;  %v602_v2 = vsel %vm248_vm4, 0.25, %v774_v31  ;;  %v66_v7 = vsub.f32 0.0, %v58_v55  ;;  %vm220_vm5 = vcmp.ge.f32.partialorder %v499_v0, 0.0  ;;  %v638_v50 = vld [vmem:[#allocation2 + $0x38] sm:$0xff] }
  0x35   :  { %v610_v11 = vmax.f32 %v89_v58, 0.0  ;;  %vm221_vm6 = vcmp.ge.f32.partialorder %v501_v1, 0.0  ;;  %v627_v29 = vmul.f32 %v184_v63, %v514_v15  ;;  %vm222_vm9 = vcmp.ge.f32.partialorder %v505_v4, 0.0 }
  0x36   :  { %v564_v46 = vpop.eup %336  ;;  %v80_v30 = vmul.f32 1.442695, %v66_v7  ;;  %vm223_vm12 = vcmp.ge.f32.partialorder %v508_v9, 0.0  ;;  %vm224_vm14 = vcmp.ge.f32.partialorder %v514_v15, 0.0 }
  0x37   :  { %v576_v51 = vpop.eup %338  ;;  %v100_v52 = vadd.f32 1.0, %v564_v46  ;;  %v103_v59 = vmul.f32 -0.5, %v564_v46  ;;  %v106_v62 = vand.u32 2147483647, %v564_v46 }
  0x38   :  { %v109_v56 = vadd.f32 1.0, %v576_v51  ;;  %v112_v60 = vmul.f32 -0.5, %v576_v51  ;;  %v595_v61 = vpop.eup %340  ;;  %v115_v8 = vand.u32 2147483647, %v576_v51 }
  0x39   :  { %348 = vlog2.f32 %v100_v52  ;;  %v118_v3 = vadd.f32 1.0, %v595_v61  ;;  %v121_v5 = vmul.f32 -0.5, %v595_v61  ;;  %v613_v13 = vpop.eup %342  ;;  %v104_v14 = vadd.f32 1.0, %v103_v59 }
  0x3a   :  { %350 = vrcp.f32 %v100_v52  ;;  %v113_v16 = vadd.f32 1.0, %v112_v60  ;;  %v124_v17 = vand.u32 2147483647, %v595_v61  ;;  %v127_v20 = vadd.f32 1.0, %v613_v13 }
  0x3b   :  { %352 = vlog2.f32 %v109_v56  ;;  %v122_v18 = vadd.f32 1.0, %v121_v5  ;;  %v130_v21 = vmul.f32 -0.5, %v613_v13  ;;  %v619_v25 = vpop.eup %344  ;;  %vm621_vm7 = vcmp.lt.f32.partialorder %v106_v62, 0.0004427343 }
  0x3c   :  { %354 = vrcp.f32 %v109_v56  ;;  %v133_v28 = vand.u32 2147483647, %v613_v13  ;;  %vm629_vm8 = vcmp.lt.f32.partialorder %v115_v8, 0.0004427343  ;;  %v136_v36 = vadd.f32 1.0, %v619_v25 }
  0x3d   :  { %356 = vlog2.f32 %v118_v3  ;;  %v139_v37 = vmul.f32 -0.5, %v619_v25  ;;  %v105_v38 = vmul.f32 %v564_v46, %v104_v14  ;;  %v131_v41 = vadd.f32 1.0, %v130_v21 }
  0x3e   :  { %358 = vrcp.f32 %v118_v3  ;;  %v142_v42 = vand.u32 2147483647, %v619_v25  ;;  %v640_v52 = vpop.eup %346  ;;  %v114_v55 = vmul.f32 %v576_v51, %v113_v16  ;;  %v123_v56 = vmul.f32 %v595_v61, %v122_v18 }
  0x3f   :  { %360 = vlog2.f32 %v127_v20  ;;  %vm644_vm10 = vcmp.lt.f32.partialorder %v124_v17, 0.0004427343  ;;  %vm648_vm11 = vcmp.lt.f32.partialorder %v133_v28, 0.0004427343  ;;  %v145_v62 = vadd.f32 1.0, %v640_v52 }
  0x40   :  { %362 = vrcp.f32 %v127_v20  ;;  %v148_v63 = vmul.f32 -0.5, %v640_v52  ;;  %v140_v7 = vadd.f32 1.0, %v139_v37  ;;  %v59_v8 = vand.u32 2147483647, %v638_v50 }
  0x41   :  { %364 = vlog2.f32 %v136_v36  ;;  %v132_v17 = vmul.f32 %v613_v13, %v131_v41  ;;  %vm658_vm13 = vcmp.lt.f32.partialorder %v142_v42, 0.0004427343 }
  0x42   :  { %366 = vrcp.f32 %v136_v36  ;;  %v151_v36 = vand.u32 2147483647, %v640_v52  ;;  %v67_v0 = vsub.f32 0.0, %v59_v8 }
  0x43   :  { %v349_v59 = vpop.eup %348  ;;  %368 = vpow2.f32 %v80_v30  ;;  %v149_v30 = vadd.f32 1.0, %v148_v63 }
  0x44   :  { %v351_v3 = vpop.eup %350  ;;  %v102_v5 = vmul.f32 0.6931472, %v349_v59  ;;  %370 = vlog2.f32 %v145_v62  ;;  %vm684_vm15 = vcmp.lt.f32.partialorder %v151_v36, 0.0004427343 }
  0x45   :  { %v353_v14 = vpop.eup %352  ;;  %v228_v16 = vmul.f32 %v351_v3, %v564_v46  ;;  %372 = vrcp.f32 %v145_v62 }
  0x46   :  { %v355_v20 = vpop.eup %354  ;;  %v108_v21 = vsel %vm621_vm7, %v105_v38, %v102_v5  ;;  %v111_v28 = vmul.f32 0.6931472, %v353_v14  ;;  %v141_v38 = vmul.f32 %v619_v25, %v140_v7  ;;  %v788_v7 = vsub.f32 1.0, %v606_v6 }
  0x47   :  { %v357_v37 = vpop.eup %356  ;;  %v172_v46 = vadd.f32 %v108_v21, %v524_v23  ;;  %v236_v41 = vsel %vm220_vm5, %v351_v3, %v228_v16  ;;  %v229_v42 = vmul.f32 %v355_v20, %v576_v51 }
  0x48   :  { %v359_v59 = vpop.eup %358  ;;  %v252_v31 = vsub.f32 1.0, %v236_v41  ;;  %v117_v12 = vsel %vm629_vm8, %v114_v55, %v111_v28  ;;  %v120_v27 = vmul.f32 0.6931472, %v357_v37  ;;  %v682_v55 = vmul.f32 %v640_v52, %v149_v30 }
  0x49   :  { %v173_v63 = vadd.f32 %v117_v12, %v539_v33  ;;  %v237_v5 = vsel %vm221_vm6, %v355_v20, %v229_v42  ;;  %v230_v23 = vmul.f32 %v359_v59, %v595_v61  ;;  %v361_v3 = vpop.eup %360  ;;  %v196_v33 = vadd.f32 %v527_v24, %v172_v46 }
  0x4a   :  { %v260_v51 = vsel %vm244_vm0, %v236_v41, %v252_v31  ;;  %v253_v62 = vsub.f32 1.0, %v237_v5  ;;  %v126_v35 = vsel %vm644_vm10, %v123_v56, %v120_v27  ;;  %v363_v1 = vpop.eup %362  ;;  %vm225_vm0 = vcmp.ge.f32.partialorder %v522_v22, 0.0 }
  0x4b   :  { %v268_v61 = vsub.f32 1.0, %v260_v51  ;;  %v174_v12 = vadd.f32 %v126_v35, %v558_v44  ;;  %v238_v10 = vsel %vm222_vm9, %v359_v59, %v230_v23  ;;  %v365_v31 = vpop.eup %364  ;;  %v129_v8 = vmul.f32 0.6931472, %v361_v3 }
  0x4c   :  { %v261_v56 = vsel %vm245_vm1, %v237_v5, %v253_v62  ;;  %v254_v58 = vsub.f32 1.0, %v238_v10  ;;  %v231_v14 = vmul.f32 %v363_v1, %v613_v13  ;;  %v367_v16 = vpop.eup %366  ;;  %v197_v24 = vadd.f32 %v548_v39, %v173_v63 }
  0x4d   :  { %v276_v20 = vmul.f32 %v268_v61, %v268_v61  ;;  %v269_v21 = vsub.f32 1.0, %v261_v56  ;;  %v138_v28 = vmul.f32 0.6931472, %v365_v31  ;;  %v697_v44 = vpop.eup %368  ;;  %v135_v30 = vsel %vm648_vm11, %v132_v17, %v129_v8 }
  0x4e   :  { %v262_v4 = vsel %vm246_vm2, %v238_v10, %v254_v58  ;;  %v239_v19 = vsel %vm223_vm12, %v363_v1, %v231_v14  ;;  %v232_v36 = vmul.f32 %v367_v16, %v619_v25  ;;  %vm249_vm1 = vcmp.ge.f32.partialorder %v606_v6, 0.5  ;;  %v371_v13 = vpop.eup %370  ;;  %v50_v6 = vld [vmem:[#allocation5 + $0x30] sm:$0xff] }
  0x4f   :  { %v292_v39 = vmul.f32 %v537_v32, %v276_v20  ;;  %v277_v37 = vmul.f32 %v269_v21, %v269_v21  ;;  %v198_v46 = vadd.f32 %v561_v45, %v174_v12  ;;  %v270_v41 = vsub.f32 1.0, %v262_v4  ;;  %v373_v17 = vpop.eup %372 }
  0x50   :  { %v175_v26 = vadd.f32 %v135_v30, %v571_v48  ;;  %v255_v42 = vsub.f32 1.0, %v239_v19  ;;  %v144_v60 = vsel %vm658_vm13, %v141_v38, %v138_v28  ;;  %v240_v9 = vsel %vm224_vm14, %v367_v16, %v232_v36 }
  0x51   :  { %v300_v25 = vmul.f32 %v292_v39, %v196_v33  ;;  %v293_v59 = vmul.f32 %v553_v40, %v277_v37  ;;  %v278_v27 = vmul.f32 %v270_v41, %v270_v41  ;;  %v147_v63 = vmul.f32 0.6931472, %v371_v13 }
  0x52   :  { %v263_v32 = vsel %vm247_vm3, %v239_v19, %v255_v42  ;;  %v176_v45 = vadd.f32 %v144_v60, %v589_v57  ;;  %v256_v5 = vsub.f32 1.0, %v240_v9  ;;  %v154_v48 = vadd.f32 1.0, %v697_v44 }
  0x53   :  { %308 = vst [vmem:[#allocation7] sm:$0xff] %v300_v25  ;;  %v301_v18 = vmul.f32 %v293_v59, %v197_v24  ;;  %v294_v38 = vmul.f32 %v569_v47, %v278_v27  ;;  %v271_v15 = vsub.f32 1.0, %v263_v32  ;;  %v82_v23 = vmul.f32 1.442695, %v67_v0 }
  0x54   :  { %v199_v3 = vadd.f32 %v580_v53, %v175_v26  ;;  %v264_v40 = vsel %vm248_vm4, %v240_v9, %v256_v5  ;;  %v233_v51 = vmul.f32 %v373_v17, %v640_v52  ;;  %374 = vlog2.f32 %v154_v48 }
  0x55   :  { %309 = vst [vmem:[#allocation7 + $0x8] sm:$0xff] %v301_v18  ;;  %v302_v34 = vmul.f32 %v294_v38, %v198_v46  ;;  %v279_v57 = vmul.f32 %v271_v15, %v271_v15  ;;  %v272_v62 = vsub.f32 1.0, %v264_v40  ;;  %v153_v35 = vsel %vm684_vm15, %v682_v55, %v147_v63 }
  0x56   :  { %v200_v47 = vadd.f32 %v627_v29, %v176_v45  ;;  %v241_v0 = vsel %vm225_vm0, %v373_v17, %v233_v51  ;;  %v157_v53 = vmul.f32 -0.5, %v697_v44  ;;  %376 = vrcp.f32 %v154_v48 }
  0x57   :  { %310 = vst [vmem:[#allocation7 + $0x10] sm:$0xff] %v302_v34  ;;  %v295_v49 = vmul.f32 %v585_v54, %v279_v57  ;;  %v280_v52 = vmul.f32 %v272_v62, %v272_v62  ;;  %v257_v1 = vsub.f32 1.0, %v241_v0  ;;  %378 = vpow2.f32 %v82_v23 }
  0x58   :  { %v177_v33 = vadd.f32 %v153_v35, %v610_v11  ;;  %v193_v55 = vmul.f32 %v788_v7, %v522_v22  ;;  %v158_v31 = vadd.f32 1.0, %v157_v53  ;;  %v789_v54 = vmov 0.75  }
  0x59   :  { %v303_v61 = vmul.f32 %v295_v49, %v199_v3  ;;  %v296_v29 = vmul.f32 %v602_v2, %v280_v52  ;;  %v265_v12 = vsel %vm249_vm1, %v241_v0, %v257_v1  ;;  %v289_v58 = vsel %vm249_vm1, 0.25, %v789_v54 }
  0x5a   :  { %v273_v10 = vsub.f32 1.0, %v265_v12  ;;  %v160_v11 = vand.u32 2147483647, %v697_v44  ;;  %v201_v8 = vadd.f32 %v193_v55, %v177_v33  ;;  %v90_v22 = vsub.f32 0.0, %v556_v43 }
  0x5b   :  { %311 = vst [vmem:[#allocation7 + $0x18] sm:$0xff] %v303_v61  ;;  %v304_v56 = vmul.f32 %v296_v29, %v200_v47  ;;  %v159_v20 = vmul.f32 %v697_v44, %v158_v31  ;;  %vm226_vm3 = vcmp.ge.f32.partialorder %v556_v43, 0.0  ;;  %v186_v36 = vsub.f32 1.0, %v50_v6 }
  0x5c   :  { %v281_v14 = vmul.f32 %v273_v10, %v273_v10  ;;  %vm745_vm2 = vcmp.lt.f32.partialorder %v160_v11, 0.0004427343  ;;  %v98_v19 = vmax.f32 %v90_v22, 0.0  ;;  %vm250_vm4 = vcmp.ge.f32.partialorder %v50_v6, 0.5 }
  0x5d   :  { %312 = vst [vmem:[#allocation7 + $0x20] sm:$0xff] %v304_v56  ;;  %v194_v42 = vmul.f32 %v186_v36, %v556_v43  ;;  %v290_v25 = vsel %vm250_vm4, 0.25, %v789_v54  ;;  %v91_v45 = vsub.f32 0.0, %v638_v50  ;;  %v51_v43 = vld [vmem:[#allocation5 + $0x38] sm:$0xff]  ;;  %vm227_vm6 = vcmp.ge.f32.partialorder %v638_v50, 0.0 }
  0x5e   :  { %v375_v16 = vpop.eup %374  ;;  %v297_v2 = vmul.f32 %v289_v58, %v281_v14  ;;  %v187_v3 = vsub.f32 1.0, %v51_v43  ;;  %vm251_vm7 = vcmp.ge.f32.partialorder %v51_v43, 0.5 }
  0x5f   :  { %v156_v24 = vmul.f32 0.6931472, %v375_v16  ;;  %v99_v23 = vmax.f32 %v91_v45, 0.0  ;;  %v291_v53 = vsel %vm251_vm7, 0.25, %v789_v54 }
  0x60   :  { %v377_v28 = vpop.eup %376  ;;  %v305_v4 = vmul.f32 %v297_v2, %v201_v8  ;;  %v195_v35 = vmul.f32 %v187_v3, %v638_v50 }
  0x61   :  { %v379_v30 = vpop.eup %378  ;;  %v234_v13 = vmul.f32 %v377_v28, %v697_v44  ;;  %v162_v39 = vsel %vm745_vm2, %v159_v20, %v156_v24 }
  0x62   :  { %313 = vst [vmem:[#allocation7 + $0x28] sm:$0xff] %v305_v4  ;;  %v163_v37 = vadd.f32 1.0, %v379_v30  ;;  %v178_v26 = vadd.f32 %v162_v39, %v98_v19  ;;  %v166_v60 = vmul.f32 -0.5, %v379_v30  ;;  %v169_v63 = vand.u32 2147483647, %v379_v30 }
  0x63   :  { %v242_v46 = vsel %vm226_vm3, %v377_v28, %v234_v13 }
  0x64   :  { %v258_v41 = vsub.f32 1.0, %v242_v46  ;;  %380 = vlog2.f32 %v163_v37  ;;  %v202_v59 = vadd.f32 %v194_v42, %v178_v26  ;;  %v167_v27 = vadd.f32 1.0, %v166_v60 }
  0x65   :  { %382 = vrcp.f32 %v163_v37  ;;  %vm170_vm5 = vcmp.lt.f32.partialorder %v169_v63, 0.0004427343 }
  0x66   :  { %v266_v9 = vsel %vm250_vm4, %v242_v46, %v258_v41  ;;  %v168_v48 = vmul.f32 %v379_v30, %v167_v27 }
  0x67   :  { %v274_v17 = vsub.f32 1.0, %v266_v9 }
  0x69   :  { %v282_v44 = vmul.f32 %v274_v17, %v274_v17 }
  0x6b   :  { %v298_v32 = vmul.f32 %v290_v25, %v282_v44 }
  0x6d   :  { %v306_v5 = vmul.f32 %v298_v32, %v202_v59 }
  0x6e   :  { %v381_v18 = vpop.eup %380 }
  0x6f   :  { %v383_v38 = vpop.eup %382  ;;  %314 = vst [vmem:[#allocation7 + $0x30] sm:$0xff] %v306_v5  ;;  %v165_v15 = vmul.f32 0.6931472, %v381_v18 }
  0x70   :  { %v235_v40 = vmul.f32 %v383_v38, %v379_v30 }
  0x71   :  { %v171_v51 = vsel %vm170_vm5, %v168_v48, %v165_v15 }
  0x72   :  { %v243_v34 = vsel %vm227_vm6, %v383_v38, %v235_v40  ;;  %v179_v62 = vadd.f32 %v171_v51, %v99_v23 }
  0x73   :  { %v259_v57 = vsub.f32 1.0, %v243_v34 }
  0x74   :  { %v203_v49 = vadd.f32 %v195_v35, %v179_v62 }
  0x75   :  { %v267_v47 = vsel %vm251_vm7, %v243_v34, %v259_v57 }
  0x76   :  { %v275_v0 = vsub.f32 1.0, %v267_v47 }
  0x78   :  { %v283_v52 = vmul.f32 %v275_v0, %v275_v0 }
  0x7a   :  { %v299_v1 = vmul.f32 %v291_v53, %v283_v52 }
  0x7c   :  { %v307_v33 = vmul.f32 %v299_v1, %v203_v49 }
  0x7e   :  { %315 = vst [vmem:[#allocation7 + $0x38] sm:$0xff] %v307_v33 }
  0x7f   :  { %439 = shalt.err (!%p436_p6)
}
  0x80   :  { %s440_s8 = scalar_lea.hbm %s773_s2, 1024 }
  0x81   :  { %p441_p7 = scmp.ne.s32.totalorder %s773_s2, %s440_s8  ;;  %p444_p8 = scmp.lt.u32.totalorder %s440_s8, %s773_s2 }
  0x83   :  { %p446_p9 = pnand %p444_p8, %p441_p7 }
  0x85   :  { %449 = shalt.err (!%p446_p9)
}
  0x86   :  { %325 = dma.vmem_to_hbm [thread:$0]  %s323_s4, 1024, %s773_s2, [#allocation4]  }
  0x87   :  { %454 = dma.done.wait [#allocation4], 1024  }
  0x88   :  { %455 = vsyncadd [#allocation4], 4294966272 }
  0x89   :  { %329 = vsyncpa [#allocation3], 1 }
  0x8a   :  { %330 = vsyncpa [#allocation6], 1 }
  0x8b   :  { %331 = vsyncpa [#allocation4], 1 }

</bundles_post_ra>
